<compile_context>
chip_gen: v7x
topology: tpu7x:2x2x1
jax: 0.10.0
libtpu: 0.0.40
codegen_flags: <defaults>
</compile_context>

<pallas_src>
import functools

import jax
import jax.numpy as jnp
from jax.experimental import pallas as pl
from jax.experimental.pallas import tpu as pltpu

IN_F = 7
HID = 50
OUT_F = 1


def _round_up(n, m):
    return ((n + m - 1) // m) * m


def _mlp_kernel(xT_ref, w1_ref, b1_ref, w2_ref, b2_ref, o_ref):
    # Hidden layer (transposed): [50,7] @ [7,TM] + [50,1] -> tanh -> [50,TM]
    h = jnp.dot(w1_ref[...], xT_ref[...], preferred_element_type=jnp.float32)
    h = jnp.tanh(h + b1_ref[...])
    # Output layer (transposed): [1,50] @ [50,TM] + [1,1] -> [1,TM] (lane-dense store)
    y = jnp.dot(w2_ref[...], h, preferred_element_type=jnp.float32) + b2_ref[...]
    o_ref[...] = y.astype(o_ref.dtype)


@functools.partial(jax.jit, static_argnames=("tm",))
def sat_simple_net_7(x, w1, b1, w2, b2, *, tm=1024):
    """Forward pass of SatSimpleNet_7 in one Pallas kernel.

    Args (PyTorch-native layouts):
      x:  [B, 7]   float32
      w1: [50, 7]  float32   (lin1.weight)
      b1: [50]     float32   (lin1.bias)
      w2: [1, 50]  float32   (lin_last.weight)
      b2: [1]      float32   (lin_last.bias)
    Returns:
      [B, 1] float32
    """
    B = x.shape[0]
    # Batch tile: multiple of 128 lanes, capped at `tm`.  Tiles are tiny
    # (8 x TM x 4B per buffer) so this fits comfortably in VMEM on all chips,
    # including v7x's 64 MiB part, with depth-2 double buffering.
    TM = min(tm, _round_up(B, 128))
    B_pad = _round_up(B, TM)
    grid = (B_pad // TM,)

    # Layout plumbing (done once in the wrapper, not per grid step):
    # batch on the lane axis; zero-pad batch to a multiple of TM.
    xT = jnp.zeros((IN_F, B_pad), x.dtype).at[:, :B].set(x.T)
    b1c = b1.reshape(HID, 1).astype(jnp.float32)      # broadcasts over TM lanes
    b2c = b2.reshape(OUT_F, 1).astype(jnp.float32)

    cost = pl.CostEstimate(
        flops=2 * B_pad * IN_F * HID + 2 * B_pad * HID * OUT_F,
        transcendentals=HID * B_pad,
        bytes_accessed=4 * (IN_F * B_pad + OUT_F * B_pad
                            + HID * IN_F + HID + HID * OUT_F + OUT_F),
    )

    out_t = pl.pallas_call(
        _mlp_kernel,
        out_shape=jax.ShapeDtypeStruct((OUT_F, B_pad), jnp.float32),
        grid=grid,
        in_specs=[
            # x^T tile marches along the batch (lane) axis.
            pl.BlockSpec((IN_F, TM), lambda i: (0, i)),
            # Weights/biases: constant index_map -> resident across grid steps.
            pl.BlockSpec((HID, IN_F), lambda i: (0, 0)),
            pl.BlockSpec((HID, 1), lambda i: (0, 0)),
            pl.BlockSpec((OUT_F, HID), lambda i: (0, 0)),
            pl.BlockSpec((OUT_F, 1), lambda i: (0, 0)),
        ],
        # Lane-dense output slab [1, TM] per step (no masked vst.msk stores).
        out_specs=pl.BlockSpec((OUT_F, TM), lambda i: (0, i)),
        compiler_params=pltpu.CompilerParams(
            dimension_semantics=("parallel",),  # megacore split on v7x
        ),
        cost_estimate=cost,
    )(xT, w1, b1c, w2, b2c)

    # Back to the PyTorch output layout [B, 1].
    return out_t[0, :B].reshape(B, 1)


def init_params(key):
    """Deterministic init matching nn.Linear's U(-1/sqrt(fan_in), 1/sqrt(fan_in)),
    in PyTorch-native layouts (weight = [out_features, in_features])."""
    k1, k2, k3, k4 = jax.random.split(key, 4)
    lim1 = 1.0 / jnp.sqrt(float(IN_F))
    lim2 = 1.0 / jnp.sqrt(float(HID))
    w1 = jax.random.uniform(k1, (HID, IN_F), jnp.float32, -lim1, lim1)
    b1 = jax.random.uniform(k2, (HID,), jnp.float32, -lim1, lim1)
    w2 = jax.random.uniform(k3, (OUT_F, HID), jnp.float32, -lim2, lim2)
    b2 = jax.random.uniform(k4, (OUT_F,), jnp.float32, -lim2, lim2)
    return w1, b1, w2, b2


if __name__ == "__main__":
    key = jax.random.PRNGKey(0)
    kx, kp = jax.random.split(key)

    B = 8
    x = jax.random.normal(kx, (B, IN_F), jnp.float32)
    w1, b1, w2, b2 = init_params(kp)

    out = sat_simple_net_7(x, w1, b1, w2, b2)
    out = jax.block_until_ready(out)

    # Pure-JAX reference (nn.Linear semantics: x @ W.T + b).
    ref = jnp.tanh(x @ w1.T + b1) @ w2.T + b2
    assert out.shape == (B, 1)
    assert jnp.allclose(out, ref, atol=1e-5, rtol=1e-5)

    # Also exercise a batch that spans multiple grid steps / non-multiple of TM.
    B2 = 300
    x2 = jax.random.normal(kx, (B2, IN_F), jnp.float32)
    out2 = jax.block_until_ready(sat_simple_net_7(x2, w1, b1, w2, b2, tm=128))
    ref2 = jnp.tanh(x2 @ w1.T + b1) @ w2.T + b2
    assert out2.shape == (B2, 1)
    assert jnp.allclose(out2, ref2, atol=1e-5, rtol=1e-5)

    print("KERNEL_OK")
</pallas_src>

<mosaic_0001>
module attributes {stable_mosaic.version = 11 : i64} {
  func.func @_mlp_kernel(%arg0: i32, %arg1: memref<7x128xf32, #tpu.memory_space<vmem>>, %arg2: memref<50x7xf32, #tpu.memory_space<vmem>>, %arg3: memref<50x1xf32, #tpu.memory_space<vmem>>, %arg4: memref<1x50xf32, #tpu.memory_space<vmem>>, %arg5: memref<1x1xf32, #tpu.memory_space<vmem>>, %arg6: memref<1x128xf32, #tpu.memory_space<vmem>>) attributes {dimension_semantics = [#tpu.dimension_semantics<parallel>], iteration_bounds = array<i64: 1>, scalar_prefetch = 0 : i64, scratch_operands = 0 : i64, tpu.core_type = #tpu.core_type<tc>, window_params = [{transform_indices = @transform_0, window_bounds = array<i64: 7, 128>}, {pipeline_mode = #tpu.pipeline_mode<synchronous>, transform_indices = @transform_1, window_bounds = array<i64: 50, 7>}, {pipeline_mode = #tpu.pipeline_mode<synchronous>, transform_indices = @transform_2, window_bounds = array<i64: 50, 1>}, {pipeline_mode = #tpu.pipeline_mode<synchronous>, transform_indices = @transform_3, window_bounds = array<i64: 1, 50>}, {pipeline_mode = #tpu.pipeline_mode<synchronous>, transform_indices = @transform_4, window_bounds = array<i64: 1, 1>}, {transform_indices = @transform_5, window_bounds = array<i64: 1, 128>}]} {
    %c0 = arith.constant 0 : index
    %c0_0 = arith.constant 0 : index
    %0 = vector.load %arg2[%c0, %c0_0] : memref<50x7xf32, #tpu.memory_space<vmem>>, vector<50x7xf32>
    %c0_1 = arith.constant 0 : index
    %c0_2 = arith.constant 0 : index
    %1 = vector.load %arg1[%c0_1, %c0_2] : memref<7x128xf32, #tpu.memory_space<vmem>>, vector<7x128xf32>
    %cst = arith.constant dense<0.000000e+00> : vector<50x128xf32>
    %2 = tpu.matmul %0, %1, %cst {dimension_numbers = #tpu.dot_dimension_numbers<[1], [0], [0], [1], [0, 0, 1, 1], [], []>} : vector<50x7xf32>, vector<7x128xf32>, vector<50x128xf32> -> vector<50x128xf32>
    %c0_3 = arith.constant 0 : index
    %c0_4 = arith.constant 0 : index
    %3 = vector.load %arg3[%c0_3, %c0_4] : memref<50x1xf32, #tpu.memory_space<vmem>>, vector<50x1xf32>
    %4 = vector.broadcast %3 : vector<50x1xf32> to vector<50x128xf32>
    %5 = arith.addf %2, %4 : vector<50x128xf32>
    %6 = math.tanh %5 : vector<50x128xf32>
    %c0_5 = arith.constant 0 : index
    %c0_6 = arith.constant 0 : index
    %7 = vector.load %arg4[%c0_5, %c0_6] : memref<1x50xf32, #tpu.memory_space<vmem>>, vector<1x50xf32>
    %cst_7 = arith.constant dense<0.000000e+00> : vector<1x128xf32>
    %8 = tpu.matmul %7, %6, %cst_7 {dimension_numbers = #tpu.dot_dimension_numbers<[1], [0], [0], [1], [0, 0, 1, 1], [], []>} : vector<1x50xf32>, vector<50x128xf32>, vector<1x128xf32> -> vector<1x128xf32>
    %c0_8 = arith.constant 0 : index
    %c0_9 = arith.constant 0 : index
    %9 = vector.load %arg5[%c0_8, %c0_9] : memref<1x1xf32, #tpu.memory_space<vmem>>, vector<1x1xf32>
    %10 = vector.broadcast %9 : vector<1x1xf32> to vector<1x128xf32>
    %11 = arith.addf %8, %10 : vector<1x128xf32>
    %c0_10 = arith.constant 0 : index
    %c0_11 = arith.constant 0 : index
    %12 = vector.load %arg6[%c0_10, %c0_11] : memref<1x128xf32, #tpu.memory_space<vmem>>, vector<1x128xf32>
    tpu.vector_store %arg6[%c0_10, %c0_11], %11 {strides = array<i32>} : memref<1x128xf32, #tpu.memory_space<vmem>>, vector<1x128xf32>,
    return
  }
  func.func @transform_0(%arg0: i32) -> (i32, i32) {
    %c0_i32 = arith.constant 0 : i32
    %c0_i32_0 = arith.constant 0 : i32
    return %c0_i32, %arg0 : i32, i32
  }
  func.func @transform_1(%arg0: i32) -> (i32, i32) {
    %c0_i32 = arith.constant 0 : i32
    %c0_i32_0 = arith.constant 0 : i32
    %c0_i32_1 = arith.constant 0 : i32
    return %c0_i32, %c0_i32_0 : i32, i32
  }
  func.func @transform_2(%arg0: i32) -> (i32, i32) {
    %c0_i32 = arith.constant 0 : i32
    %c0_i32_0 = arith.constant 0 : i32
    %c0_i32_1 = arith.constant 0 : i32
    return %c0_i32, %c0_i32_0 : i32, i32
  }
  func.func @transform_3(%arg0: i32) -> (i32, i32) {
    %c0_i32 = arith.constant 0 : i32
    %c0_i32_0 = arith.constant 0 : i32
    %c0_i32_1 = arith.constant 0 : i32
    return %c0_i32, %c0_i32_0 : i32, i32
  }
  func.func @transform_4(%arg0: i32) -> (i32, i32) {
    %c0_i32 = arith.constant 0 : i32
    %c0_i32_0 = arith.constant 0 : i32
    %c0_i32_1 = arith.constant 0 : i32
    return %c0_i32, %c0_i32_0 : i32, i32
  }
  func.func @transform_5(%arg0: i32) -> (i32, i32) {
    %c0_i32 = arith.constant 0 : i32
    %c0_i32_0 = arith.constant 0 : i32
    return %c0_i32, %arg0 : i32, i32
  }
}

</mosaic_0001>

<bundles_post_ra>
// kernel: sat_simple_net_7.1
= control target key start
LH: loop header
LB: loop body
LE: loop exit
PB: predicated region body
PF: predicated region fallthrough
CT: control target
= control target key end

     0   :  { %vm94_vm0 = vcmask 1046528   ;;  %vm72_vm1 = vcmask 56320   ;;  %v394_v0 = vmov 0.0   ;;  %vm395_vm2 = vmmov 0   ;;  %s507_s0 = inlined_call_operand.vmem [shape: f32[7,128], index: 0, kind: input, shape index: {}]   ;;  %s508_s1 = inlined_call_operand.vmem [shape: f32[50,7], index: 1, kind: input, shape index: {}]   ;;  %s509_s2 = inlined_call_operand.vmem [shape: f32[50,1], index: 2, kind: input, shape index: {}]   ;;  %s510_s4 = inlined_call_operand.<no memory space> [shape: f32[1,1], index: 4, kind: input, shape index: {}]   ;;  %s511_s3 = inlined_call_operand.vmem [shape: f32[1,50], index: 3, kind: input, shape index: {}]   ;;  %s512_s5 = inlined_call_operand.vmem [shape: f32[1,128], index: 5, kind: output, shape index: {}]  }
   0x1   :  { %325 = vmatprep.subr.mxu0 %v394_v0  ;;  %v29_v1 = vld [vmem:[%s507_s0] sm:$0x7f]  ;;  %327 = vmatprep.mubr.msk.f32.mxu0 %vm395_vm2, %v394_v0  ;;  %v10_v3 = vstv %s510_s4  ;;  %v396_v4 = vmov 0   ;;  %v23_v6 = vld [vmem:[%s508_s1 + $0x8] sm:$0xff]  ;;  %v32_v7 = vld [vmem:[%s509_s2 + $0x10] sm:$0xff]  ;;  %v397_v19 = vmov 0.0|0.0   ;;  %v212_v59 = vlaneseq }
   0x2   :  { %v22_v2 = vld [vmem:[%s508_s1] sm:$0xff]  ;;  %326 = vmatpush3.msk.msra.mxu0 %vm94_vm0, %v29_v1  ;;  %378 = vset.pattern.permute.xlu0 %v396_v4  ;;  %11 = vst [vmem:[#allocation2] sm:$0x1] %v10_v3  ;;  %v31_v8 = vld [vmem:[%s509_s2 + $0x8] sm:$0xff]  ;;  %v33_v9 = vld [vmem:[%s509_s2 + $0x18] sm:$0xff]  ;;  %vm220_vm3 = vcmask 1041408  }
   0x3   :  { %328 = vmatmul.mubr.msk.f32.vlgmr.msra.gmra.mrb[0].mxu0 %vm72_vm1, %v22_v2  ;;  %v30_v5 = vld [vmem:[%s509_s2] sm:$0xff]  ;;  %379 = vset.pattern.permute.xlu1 %v396_v4  ;;  %v24_v10 = vld [vmem:[%s508_s1 + $0x10] sm:$0xff]  ;;  %v35_v12 = vld [vmem:[%s509_s2 + $0x28] sm:$0xff]  ;;  %vm216_vm4 = vcmask 408576   ;;  %v213_v60 = vshrl.u32 %v212_v59, 7 }
   0x4   :  { %330 = vmatprep.mubr.msk.f32.mxu0 %vm395_vm2, %v394_v0  ;;  %39 = vperm.xlu0 %378, %v30_v5   ;;  %v34_v11 = vld [vmem:[%s509_s2 + $0x20] sm:$0xff]  ;;  %v25_v13 = vld [vmem:[%s508_s1 + $0x18] sm:$0xff]  ;;  %v36_v14 = vld [vmem:[%s509_s2 + $0x30] sm:$0x3] }
   0x5   :  { %49 = vperm.xlu1 %379, %v32_v7   ;;  %362 = vmatprep.mubr.msk.f32.mxu1 %vm395_vm2, %v394_v0  ;;  %v26_v16 = vld [vmem:[%s508_s1 + $0x20] sm:$0xff]  ;;  %v27_v17 = vld [vmem:[%s508_s1 + $0x28] sm:$0xff]  ;;  %v28_v18 = vld [vmem:[%s508_s1 + $0x30] sm:$0x3]  ;;  %v214_v61 = vsub.s32 0, %v213_v60 }
   0x6   :  { %365 = vmatprep.subr.bf16.mxu1 %v397_v19  ;;  %v205_v57 = vld [vmem:[%s511_s3] sm:$0x1] }
   0x7   :  { %331 = vmatmul.mubr.msk.f32.gmra.mrb[2].mxu0 %vm72_vm1, %v23_v6 }
   0x8   :  { %333 = vmatprep.mubr.msk.f32.mxu0 %vm395_vm2, %v394_v0  ;;  %44 = vperm.xlu0 %378, %v31_v8  }
   0x9   :  { %54 = vperm.xlu1 %379, %v33_v9   ;;  %v206_v15 = vld [vmem:[#allocation2] sm:$0x1] }
   0xb   :  { %334 = vmatmul.mubr.msk.f32.gmra.mrb[4].mxu0 %vm72_vm1, %v24_v10 }
   0xc   :  { %336 = vmatprep.mubr.msk.f32.mxu0 %vm395_vm2, %v394_v0  ;;  %59 = vperm.xlu0 %378, %v34_v11  }
   0xd   :  { %64 = vperm.xlu1 %379, %v35_v12  }
   0xf   :  { %337 = vmatmul.mubr.msk.f32.gmra.mrb[6].mxu0 %vm72_vm1, %v25_v13 }
  0x10   :  { %339 = vmatprep.mubr.msk.f32.mxu0 %vm395_vm2, %v394_v0  ;;  %69 = vperm.xlu0 %378, %v36_v14  }
  0x11   :  { %209 = vperm.xlu1 %379, %v206_v15  }
  0x13   :  { %340 = vmatmul.mubr.msk.f32.gmra.mrb[8].mxu0 %vm72_vm1, %v26_v16 }
  0x14   :  { %342 = vmatprep.mubr.msk.f32.mxu0 %vm395_vm2, %v394_v0 }
  0x17   :  { %343 = vmatmul.mubr.msk.f32.gmra.mrb[10].mxu0 %vm72_vm1, %v27_v17 }
  0x18   :  { %345 = vmatprep.mubr.msk.f32.mxu0 %vm395_vm2, %v394_v0 }
  0x1b   :  { %346 = vmatmul.mubr.msk.f32.gmra.mrb[12].mxu0 %vm72_vm1, %v28_v18 }
  0x83   :  { %v40_v20 = vpop.permute.xlu0 %39 }
  0x84   :  { %v50_v28 = vpop.permute.xlu1 %49 }
  0x87   :  { %v45_v24 = vpop.permute.xlu0 %44 }
  0x88   :  { %v55_v32 = vpop.permute.xlu1 %54 }
  0x8b   :  { %v60_v39 = vpop.permute.xlu0 %59 }
  0x8c   :  { %v65_v43 = vpop.permute.xlu1 %64 }
  0x8f   :  { %v70_v48 = vpop.permute.xlu0 %69 }
  0x90   :  { %v210_v62 = vpop.permute.xlu1 %209 }
  0x91   :  { %v215_v63 = vrot.slane %v210_v62, %v214_v61 }
  0xd6   :  { %v164_v21 = vpop.f32.mrb[0].mxu0 }
  0xd7   :  { %v329_v22 = vpop.f32.mrb[1].mxu0  ;;  %v165_v23 = vadd.f32 %v164_v21, %v40_v20 }
  0xd9   :  { %380 = vtanh.f32 %v165_v23 }
  0xda   :  { %v169_v25 = vpop.f32.mrb[2].mxu0 }
  0xdb   :  { %v170_v26 = vadd.f32 %v169_v25, %v45_v24  ;;  %v332_v27 = vpop.f32.mrb[3].mxu0 }
  0xdd   :  { %382 = vtanh.f32 %v170_v26 }
  0xde   :  { %v174_v29 = vpop.f32.mrb[4].mxu0 }
  0xdf   :  { %v335_v30 = vpop.f32.mrb[5].mxu0  ;;  %v175_v31 = vadd.f32 %v174_v29, %v50_v28 }
  0xe1   :  { %384 = vtanh.f32 %v175_v31 }
  0xe2   :  { %v179_v33 = vpop.f32.mrb[6].mxu0 }
  0xe3   :  { %v180_v34 = vadd.f32 %v179_v33, %v55_v32  ;;  %v338_v35 = vpop.f32.mrb[7].mxu0  ;;  %v381_v36 = vpop.eup %380 }
  0xe5   :  { %386 = vtanh.f32 %v180_v34 }
  0xe6   :  { %v184_v37 = vpop.f32.mrb[8].mxu0 }
  0xe7   :  { %v383_v38 = vpop.eup %382  ;;  %v341_v40 = vpop.f32.mrb[9].mxu0  ;;  %v185_v41 = vadd.f32 %v184_v37, %v60_v39 }
  0xe8   :  { %v366_v42 = vpack.c.bf16 %v383_v38, %v381_v36 }
  0xe9   :  { %388 = vtanh.f32 %v185_v41 }
  0xea   :  { %v189_v44 = vpop.f32.mrb[10].mxu0  ;;  %367 = vmatpush3.bf16.msra.mxu1 %v366_v42 }
  0xeb   :  { %v190_v45 = vadd.f32 %v189_v44, %v65_v43  ;;  %v344_v46 = vpop.f32.mrb[11].mxu0  ;;  %368 = vmatprep.subr.bf16.mxu1 %v397_v19  ;;  %v385_v47 = vpop.eup %384 }
  0xed   :  { %390 = vtanh.f32 %v190_v45 }
  0xee   :  { %v194_v49 = vpop.f32.mrb[12].mxu0 }
  0xef   :  { %v387_v50 = vpop.eup %386  ;;  %v195_v51 = vadd.f32 %v194_v49, %v70_v48  ;;  %v347_v52 = vpop.f32.mrb[13].mxu0 }
  0xf0   :  { %v369_v53 = vpack.c.bf16 %v387_v50, %v385_v47 }
  0xf1   :  { %392 = vtanh.f32 %v195_v51 }
  0xf2   :  { %370 = vmatpush3.bf16.msra.mxu1 %v369_v53 }
  0xf3   :  { %371 = vmatprep.subr.bf16.mxu1 %v397_v19  ;;  %v389_v54 = vpop.eup %388 }
  0xf7   :  { %v391_v55 = vpop.eup %390 }
  0xf8   :  { %v372_v56 = vpack.c.bf16 %v391_v55, %v389_v54 }
  0xfa   :  { %373 = vmatpush3.bf16.msra.mxu1 %v372_v56 }
  0xfb   :  { %360 = vmatprep.subr.mxu1 %v394_v0  ;;  %v393_v58 = vpop.eup %392 }
  0xfe   :  { %361 = vmatpush3.msk.msra.mxu1 %vm220_vm3, %v393_v58 }
  0xff   :  { %363 = vmatmul.mubr.msk.f32.vlgmr.msra.gmra.mrb[0].mxu1 %vm216_vm4, %v205_v57 }
 0x1d2   :  { %v290_v1 = vpop.f32.mrb[0].mxu1 }
 0x1d3   :  { %v291_v2 = vadd.f32 %v290_v1, %v215_v63  ;;  %v364_v3 = vpop.f32.mrb[1].mxu1 }
 0x1d5   :  { %294 = vst [vmem:[%s512_s5] sm:$0x1] %v291_v2 }

</bundles_post_ra>
